<compile_context>
chip_gen: v7x
topology: tpu7x:2x2x1
jax: 0.10.0
libtpu: 0.0.40
codegen_flags: <defaults>
</compile_context>

<pallas_src>
import functools
import math

import jax
import jax.numpy as jnp
from jax.experimental import pallas as pl
from jax.experimental.pallas import tpu as pltpu

BN_EPS = 1e-5   # nn.BatchNorm1d default eps
L2_EPS = 1e-8   # l2norm eps (added AFTER sqrt, matching the reference)


def _visual_sa_kernel(local_ref, gs_ref, wl_ref, bl_ref, out_ref):
    TB, R, D = local_ref.shape

    local = local_ref[...]                                       # (TB, R, D) bf16

    # embedding_local: Linear -> BatchNorm1d(R) [folded, eval] -> Tanh -> Dropout[id]
    # bf16 operands straight into the MXU, f32 accumulation; epilogue stays f32.
    l_lin = jnp.dot(local.reshape(TB * R, D), wl_ref[...],
                    preferred_element_type=jnp.float32) + bl_ref[...]
    l_emb = jnp.tanh(l_lin).reshape(TB, R, D)                    # (TB, R, D) f32

    # region logits: <l_emb[b,r,:], tanh(g_emb)[b,:] * wc>  (wc folded into gs on
    # the host; the Linear(D,1) bias shifts every logit equally -> cancelled by
    # the softmax and omitted).
    logits = jnp.sum(l_emb * gs_ref[...][:, None, :], axis=-1)   # (TB, R) f32

    # softmax over the region axis (dim=1); EUP reciprocal keeps the divide
    # off the VPU.
    logits = logits - jnp.max(logits, axis=1, keepdims=True)
    e = jnp.exp(logits)
    p = e * pl.reciprocal(jnp.sum(e, axis=1, keepdims=True), approx=True)

    # attention-weighted pooling on the VPU/XLU (broadcast-mul + sublane reduce):
    # with q == 1 an MXU contraction has near-zero fill and would contend with
    # the dominant matmul's issue slot.
    new_g = jnp.sum(p[:, :, None] * local.astype(jnp.float32), axis=1)   # (TB, D)

    # l2norm along the feature axis (eps added after sqrt, as in the reference)
    nrm = jnp.sqrt(jnp.sum(new_g * new_g, axis=-1, keepdims=True)) + L2_EPS
    out_ref[...] = (new_g * pl.reciprocal(nrm, approx=True)).astype(out_ref.dtype)


def _resident_spec(shape):
    """Constant-index (resident) weight block; request a single VMEM buffer."""
    idx = lambda b: (0, 0)
    try:
        return pl.BlockSpec(shape, idx, pipeline_mode=pl.Buffered(1))
    except Exception:   # older Pallas without pipeline_mode / Buffered(1)
        return pl.BlockSpec(shape, idx)


@functools.partial(jax.jit, static_argnames=("block_b",))
def visual_sa(local, raw_global, params, *, block_b=None):
    B, R, D = local.shape
    out_dtype = local.dtype
    wl, bl, wg, bg, wc, bc = params
    del bc  # constant shift of every region logit; cancelled by the softmax

    # Eval-mode BatchNorm1d with fresh running stats == scalar 1/sqrt(1+eps).
    s = 1.0 / math.sqrt(1.0 + BN_EPS)

    # --- global branch hoisted out of the kernel (one small (B,D)x(D,D) matmul,
    # keeps wg out of VMEM entirely); wc folded in so `common` never exists. ---
    g_scaled = (jnp.tanh((raw_global.astype(jnp.float32) @ wg.astype(jnp.float32)
                          + bg.astype(jnp.float32)) * s)
                * wc.astype(jnp.float32))                       # (B, D) f32

    # --- local branch: fold BN scale into the weight, feed the MXU bf16
    # operands (f32 accumulation); bias stays f32 (added post-accumulate). ---
    wl_b = (wl * s).astype(jnp.bfloat16)                        # (D, D)
    bl_f = (bl * s).astype(jnp.float32)                         # (1, D)
    local_b = local.astype(jnp.bfloat16)                        # (B, R, D)

    # --- generation-gated tiling / VMEM accounting ---
    try:
        vmem_cap = int(pltpu.get_tpu_info().vmem_capacity_bytes)
    except Exception:                       # conservative default: v7x-sized VMEM
        vmem_cap = 64 * 1024 * 1024
    big_vmem = vmem_cap >= 100 * 1024 * 1024    # v5e/v6e (128 MiB) vs v7x (64 MiB)

    ALIGN = 16   # bf16 packs 16 rows per sublane tile
    # Per-batch-row footprint: double-buffered bf16 local tile, f32 temporaries
    # (l_emb + upcast local for pooling), double-buffered (row, D) f32 vectors.
    per_row = R * D * (2 * 2 + 2 * 4) + 4 * D * 4
    if block_b is None:
        budget = (24 if big_vmem else 8) * 1024 * 1024
        block_b = max(1, budget // max(per_row, 1))
    # v7x megacore: keep >= 2 (roughly balanced) grid steps when the batch is
    # large enough to split.
    if B >= 2 * ALIGN:
        block_b = min(block_b, pl.cdiv(pl.cdiv(B, 2), ALIGN) * ALIGN)
    block_b = min(block_b, B)
    if block_b != B:
        block_b = max(ALIGN, (block_b // ALIGN) * ALIGN)

    grid = (pl.cdiv(B, block_b),)
    in_specs = [
        pl.BlockSpec((block_b, R, D), lambda b: (b, 0, 0)),     # local (bf16, tiled)
        pl.BlockSpec((block_b, D), lambda b: (b, 0)),           # g_scaled (f32)
        _resident_spec((D, D)),                                 # wl (bf16, resident)
        _resident_spec((1, D)),                                 # bl (f32, resident)
    ]
    out_specs = pl.BlockSpec((block_b, D), lambda b: (b, 0))

    # Honest footprint (pipelined tiles + temporaries + single-buffered weights),
    # 1.5x headroom, capped at 75% of physical VMEM (~48 MiB v7x, ~96 MiB v5e/v6e).
    est = block_b * per_row + D * D * 2 + D * 4
    vmem_limit = int(min(int(0.75 * vmem_cap),
                         max(int(est * 1.5), 16 * 1024 * 1024)))

    out_elt = jnp.dtype(out_dtype).itemsize
    cost = pl.CostEstimate(
        flops=2 * B * R * D * D + 6 * B * R * D,
        transcendentals=B * R * D + B * R,
        bytes_accessed=(B * R * D * 2 + B * D * 4         # local (bf16) + g_scaled
                        + D * D * 2 + D * 4               # wl + bl
                        + B * D * out_elt),
    )

    return pl.pallas_call(
        _visual_sa_kernel,
        out_shape=jax.ShapeDtypeStruct((B, D), out_dtype),
        grid=grid,
        in_specs=in_specs,
        out_specs=out_specs,
        compiler_params=pltpu.CompilerParams(
            dimension_semantics=("parallel",),
            vmem_limit_bytes=vmem_limit),
        cost_estimate=cost,
    )(local_b, g_scaled, wl_b, bl_f)


def init_params(key, embed_dim):
    """Deterministic init matching VisualSA.init_weights (uniform(-r, r), bias=0)."""
    D = embed_dim
    kl, kg, kc = jax.random.split(key, 3)

    r_sq = math.sqrt(6.0) / math.sqrt(D + D)   # Linear(D, D)
    r_c = math.sqrt(6.0) / math.sqrt(D + 1)    # Linear(D, 1)

    wl = jax.random.uniform(kl, (D, D), jnp.float32, -r_sq, r_sq)  # (in, out)
    bl = jnp.zeros((1, D), jnp.float32)
    wg = jax.random.uniform(kg, (D, D), jnp.float32, -r_sq, r_sq)  # (in, out)
    bg = jnp.zeros((1, D), jnp.float32)
    wc = jax.random.uniform(kc, (1, D), jnp.float32, -r_c, r_c)    # Linear(D,1) weight row
    bc = jnp.zeros((1, 1), jnp.float32)
    return wl, bl, wg, bg, wc, bc


def _reference(local, raw_global, params):
    """Pure-JAX eval-mode f32 reference for the VisualSA forward pass."""
    wl, bl, wg, bg, wc, bc = params
    s = 1.0 / math.sqrt(1.0 + BN_EPS)
    l_emb = jnp.tanh((local @ wl + bl) * s)
    g_emb = jnp.tanh((raw_global @ wg + bg) * s)
    w = jnp.sum(l_emb * g_emb[:, None, :] * wc, axis=-1) + bc[0, 0]
    p = jax.nn.softmax(w, axis=1)
    new_g = jnp.sum(p[:, :, None] * local, axis=1)
    nrm = jnp.sqrt(jnp.sum(new_g * new_g, axis=-1, keepdims=True)) + L2_EPS
    return new_g / nrm


if __name__ == "__main__":
    key = jax.random.PRNGKey(0)
    k_params, k_local = jax.random.split(key, 2)

    B, R, D = 2, 8, 32   # small synthetic shapes (real VisualSA: R=36, D=1024)
    params = init_params(k_params, D)

    local = jax.random.normal(k_local, (B, R, D), dtype=jnp.float32)
    raw_global = jnp.mean(local, axis=1)   # "raw image by averaging regions"

    out = visual_sa(local, raw_global, params)
    jax.block_until_ready(out)
    assert out.shape == (B, D) and out.dtype == jnp.float32

    ref = _reference(local, raw_global, params)
    # bf16 matmul operands (perf) + approx reciprocals => looser tolerance than
    # a pure-f32 kernel; this is the flagged accuracy/perf trade-off.
    assert jnp.allclose(out, ref, atol=2e-2, rtol=2e-2), "mismatch vs reference"
    print("KERNEL_OK")
</pallas_src>

<mosaic_0001>
module attributes {stable_mosaic.version = 11 : i64} {
  func.func @_visual_sa_kernel(%arg0: i32, %arg1: memref<2x8x32xbf16, #tpu.memory_space<vmem>>, %arg2: memref<2x32xf32, #tpu.memory_space<vmem>>, %arg3: memref<32x32xbf16, #tpu.memory_space<vmem>>, %arg4: memref<1x32xf32, #tpu.memory_space<vmem>>, %arg5: memref<2x32xf32, #tpu.memory_space<vmem>>) attributes {dimension_semantics = [#tpu.dimension_semantics<parallel>], iteration_bounds = array<i64: 1>, scalar_prefetch = 0 : i64, scratch_operands = 0 : i64, tpu.core_type = #tpu.core_type<tc>, window_params = [{transform_indices = @transform_0, window_bounds = array<i64: 2, 8, 32>}, {transform_indices = @transform_1, window_bounds = array<i64: 2, 32>}, {pipeline_mode = #tpu.pipeline_mode<synchronous>, transform_indices = @transform_2, window_bounds = array<i64: 32, 32>}, {pipeline_mode = #tpu.pipeline_mode<synchronous>, transform_indices = @transform_3, window_bounds = array<i64: 1, 32>}, {transform_indices = @transform_4, window_bounds = array<i64: 2, 32>}]} {
    %c0 = arith.constant 0 : index
    %c0_0 = arith.constant 0 : index
    %c0_1 = arith.constant 0 : index
    %0 = vector.load %arg1[%c0, %c0_0, %c0_1] : memref<2x8x32xbf16, #tpu.memory_space<vmem>>, vector<2x8x32xbf16>
    %1 = vector.shape_cast %0 : vector<2x8x32xbf16> to vector<16x32xbf16>
    %c0_2 = arith.constant 0 : index
    %c0_3 = arith.constant 0 : index
    %2 = vector.load %arg3[%c0_2, %c0_3] : memref<32x32xbf16, #tpu.memory_space<vmem>>, vector<32x32xbf16>
    %cst = arith.constant dense<0.000000e+00> : vector<16x32xf32>
    %3 = tpu.matmul %1, %2, %cst {dimension_numbers = #tpu.dot_dimension_numbers<[1], [0], [0], [1], [0, 0, 1, 1], [], []>} : vector<16x32xbf16>, vector<32x32xbf16>, vector<16x32xf32> -> vector<16x32xf32>
    %c0_4 = arith.constant 0 : index
    %c0_5 = arith.constant 0 : index
    %4 = vector.load %arg4[%c0_4, %c0_5] : memref<1x32xf32, #tpu.memory_space<vmem>>, vector<1x32xf32>
    %5 = vector.broadcast %4 : vector<1x32xf32> to vector<16x32xf32>
    %6 = arith.addf %3, %5 : vector<16x32xf32>
    %7 = math.tanh %6 : vector<16x32xf32>
    %8 = vector.shape_cast %7 : vector<16x32xf32> to vector<2x8x32xf32>
    %c0_6 = arith.constant 0 : index
    %c0_7 = arith.constant 0 : index
    %9 = vector.load %arg2[%c0_6, %c0_7] : memref<2x32xf32, #tpu.memory_space<vmem>>, vector<2x32xf32>
    %10 = vector.shape_cast %9 : vector<2x32xf32> to vector<2x1x32xf32>
    %11 = vector.broadcast %10 : vector<2x1x32xf32> to vector<2x8x32xf32>
    %12 = arith.mulf %8, %11 : vector<2x8x32xf32>
    %cst_8 = arith.constant dense<0.000000e+00> : vector<2x8xf32>
    %13 = vector.multi_reduction <add>, %12, %cst_8 [2] : vector<2x8x32xf32> to vector<2x8xf32>
    %cst_9 = arith.constant dense<0xFF800000> : vector<2xf32>
    %14 = vector.multi_reduction <maximumf>, %13, %cst_9 [1] : vector<2x8xf32> to vector<2xf32>
    %15 = vector.shape_cast %14 : vector<2xf32> to vector<2x1xf32>
    %16 = vector.broadcast %15 : vector<2x1xf32> to vector<2x8xf32>
    %17 = arith.subf %13, %16 : vector<2x8xf32>
    %18 = math.exp %17 : vector<2x8xf32>
    %cst_10 = arith.constant dense<0.000000e+00> : vector<2xf32>
    %19 = vector.multi_reduction <add>, %18, %cst_10 [1] : vector<2x8xf32> to vector<2xf32>
    %20 = vector.shape_cast %19 : vector<2xf32> to vector<2x1xf32>
    %21 = tpu.reciprocal %20 {approx = true} : vector<2x1xf32> -> vector<2x1xf32>
    %22 = vector.broadcast %21 : vector<2x1xf32> to vector<2x8xf32>
    %23 = arith.mulf %18, %22 : vector<2x8xf32>
    %24 = vector.shape_cast %23 : vector<2x8xf32> to vector<2x8x1xf32>
    %25 = arith.extf %0 : vector<2x8x32xbf16> to vector<2x8x32xf32>
    %26 = vector.broadcast %24 : vector<2x8x1xf32> to vector<2x8x32xf32>
    %27 = arith.mulf %26, %25 : vector<2x8x32xf32>
    %cst_11 = arith.constant dense<0.000000e+00> : vector<2x32xf32>
    %28 = vector.multi_reduction <add>, %27, %cst_11 [1] : vector<2x8x32xf32> to vector<2x32xf32>
    %29 = arith.mulf %28, %28 : vector<2x32xf32>
    %cst_12 = arith.constant dense<0.000000e+00> : vector<2xf32>
    %30 = vector.multi_reduction <add>, %29, %cst_12 [1] : vector<2x32xf32> to vector<2xf32>
    %31 = vector.shape_cast %30 : vector<2xf32> to vector<2x1xf32>
    %32 = math.sqrt %31 : vector<2x1xf32>
    %cst_13 = arith.constant 9.99999993E-9 : f32
    %33 = vector.broadcast %cst_13 : f32 to vector<2x1xf32>
    %34 = arith.addf %32, %33 : vector<2x1xf32>
    %35 = tpu.reciprocal %34 {approx = true} : vector<2x1xf32> -> vector<2x1xf32>
    %36 = vector.broadcast %35 : vector<2x1xf32> to vector<2x32xf32>
    %37 = arith.mulf %28, %36 : vector<2x32xf32>
    %c0_14 = arith.constant 0 : index
    %c0_15 = arith.constant 0 : index
    %38 = vector.load %arg5[%c0_14, %c0_15] : memref<2x32xf32, #tpu.memory_space<vmem>>, vector<2x32xf32>
    tpu.vector_store %arg5[%c0_14, %c0_15], %37 {strides = array<i32>} : memref<2x32xf32, #tpu.memory_space<vmem>>, vector<2x32xf32>,
    return
  }
  func.func @transform_0(%arg0: i32) -> (i32, i32, i32) {
    %c0_i32 = arith.constant 0 : i32
    %c0_i32_0 = arith.constant 0 : i32
    %c0_i32_1 = arith.constant 0 : i32
    return %arg0, %c0_i32, %c0_i32_0 : i32, i32, i32
  }
  func.func @transform_1(%arg0: i32) -> (i32, i32) {
    %c0_i32 = arith.constant 0 : i32
    %c0_i32_0 = arith.constant 0 : i32
    return %arg0, %c0_i32 : i32, i32
  }
  func.func @transform_2(%arg0: i32) -> (i32, i32) {
    %c0_i32 = arith.constant 0 : i32
    %c0_i32_0 = arith.constant 0 : i32
    %c0_i32_1 = arith.constant 0 : i32
    return %c0_i32, %c0_i32_0 : i32, i32
  }
  func.func @transform_3(%arg0: i32) -> (i32, i32) {
    %c0_i32 = arith.constant 0 : i32
    %c0_i32_0 = arith.constant 0 : i32
    %c0_i32_1 = arith.constant 0 : i32
    return %c0_i32, %c0_i32_0 : i32, i32
  }
  func.func @transform_4(%arg0: i32) -> (i32, i32) {
    %c0_i32 = arith.constant 0 : i32
    %c0_i32_0 = arith.constant 0 : i32
    return %arg0, %c0_i32 : i32, i32
  }
}

</mosaic_0001>

<bundles_post_ra>
// kernel: visual_sa.1
= control target key start
LH: loop header
LB: loop body
LE: loop exit
PB: predicated region body
PF: predicated region fallthrough
CT: control target
= control target key end

     0   :  { %v348_v1 = vmov 0.0   ;;  %vm349_vm0 = vmmov 0   ;;  %s429_s0 = inlined_call_operand.vmem [shape: bf16[2,8,32], index: 0, kind: input, shape index: {}]   ;;  %s430_s1 = inlined_call_operand.vmem [shape: f32[2,32], index: 1, kind: input, shape index: {}]   ;;  %s431_s2 = inlined_call_operand.vmem [shape: bf16[32,32], index: 2, kind: input, shape index: {}]   ;;  %s432_s3 = inlined_call_operand.vmem [shape: f32[1,32], index: 3, kind: input, shape index: {}]   ;;  %s433_s4 = inlined_call_operand.hbm [shape: f32[2,32], index: 4, kind: output, shape index: {}]  }
   0x1   :  { %v306_v0 = vld [vmem:[%s431_s2] sm:$0xff]   ;;  %291 = vmatprep.subr.bf16.mxu0 %v348_v1  ;;  %v307_v2 = vld [vmem:[%s431_s2 + $0x8] sm:$0xff]   ;;  %295 = vmatprep.mubr.msk.bf16.mxu0 %vm349_vm0, %v348_v1 }
   0x2   :  { %292 = vmatpush3.bf16.msra.mxu0 %v306_v0  ;;  %v387_v3 = vld [vmem:[%s429_s0] sm:$0xff]  }
   0x3   :  { %9 = vsyncpa [#allocation3], 0  ;;  %293 = vmatprep.subr.bf16.mxu0 %v348_v1  ;;  %vm49_vm1 = vcmask 261120   ;;  %v350_v4 = vmov 1966171168   ;;  %v109_v6 = vlaneseq  ;;  %vm150_vm2 = vcmask 1041409  }
   0x4   :  { %v107_v5 = vunpack.c.l.s4 %v350_v4  ;;  %v282_v7 = vld [vmem:[%s432_s3] ss:$0 sm:$0xff]  ;;  %vm153_vm3 = vcmask 58368   ;;  %v351_v38 = vmov 0   ;;  %v209_v61 = vunpack.c.l.bf16 %v387_v3 }
   0x5   :  { %v394_v9 = vshrl.u32 %v109_v6, 7  ;;  %v287_v13 = vld.sshfl [vmem:[%s430_s1] sm:$0x11 pattern:$0x75316420]  ;;  %v141_v30 = vand.u32 127, %v109_v6  ;;  %305 = vset.pattern.permute.xlu0 %v351_v38  ;;  %304 = vset.pattern.permute.xlu1 %v351_v38  ;;  %v210_v0 = vunpack.c.h.bf16 %v387_v3 }
   0x6   :  { %294 = vmatpush3.bf16.msra.mxu0 %v307_v2  ;;  %v108_v8 = vunpack.c.0.s8 %v107_v5  ;;  %v105_v18 = vcombine.high %v287_v13, %v287_v13  ;;  %vm243_vm4 = vcmask 254976   ;;  %s352_s1 = smov [#allocation2]  }
   0x7   :  { %v122_v20 = vsub.s32 0, %v394_v9  ;;  %v144_v32 = vsub.s32 %v141_v30, %v394_v9  ;;  %v164_v39 = vsub.s32 1, %v394_v9  ;;  %s274_s3 = sshll.u32 %s352_s1, 4  ;;  %s275_s3 = int_to_ptr.vmem [resolvable:$true] %s274_s3 }
   0x8   :  { %v111_v15 = vsub.s32 %v108_v8, %v394_v9  ;;  %s324_s23 = scalar_lea.vmem %s275_s3, 32  ;;  %p329_p1 = scmp.lt.s32.totalorder %s275_s3, %s275_s3 }
   0x9   :  { %296 = vmatmul.mubr.msk.bf16.vlgmr.msra.gmra.mrb[0].mxu0 %vm49_vm1, %v387_v3  ;;  %p325_p0 = scmp.ne.s32.totalorder %s275_s3, %s324_s23  ;;  %p330_p2 = scmp.lt.s32.totalorder %s324_s23, %s324_s23 }
   0xa   :  { %v112_v19 = vrot.slane %v287_v13, %v111_v15  ;;  %v119_v21 = vrot.slane %v105_v18, %v111_v15 }
   0xb   :  { %p331_p3 = por %p330_p2, %p329_p1 }
   0xc   :  { %v123_v22 = vrot.slane %v112_v19, %v122_v20  ;;  %v127_v23 = vrot.slane %v119_v21, %v122_v20 }
   0xd   :  { %p332_p4 = pnand %p331_p3, %p325_p0 }
  0xdc   :  { %v87_v10 = vpop.f32.mrb[0].mxu0 }
  0xdd   :  { %v88_v11 = vadd.f32 %v282_v7, %v87_v10  ;;  %v297_v12 = vpop.f32.mrb[1].mxu0 }
  0xde   :  { %v90_v14 = vpop.f32.mrb[2].mxu0 }
  0xdf   :  { %310 = vtanh.f32 %v88_v11  ;;  %v91_v16 = vadd.f32 %v282_v7, %v90_v14  ;;  %v298_v17 = vpop.f32.mrb[3].mxu0 }
  0xe1   :  { %312 = vtanh.f32 %v91_v16 }
  0xe9   :  { %v311_v24 = vpop.eup %310 }
  0xea   :  { %v130_v25 = vmul.f32 %v311_v24, %v123_v22 }
  0xeb   :  { %v313_v26 = vpop.eup %312 }
  0xec   :  { %v132_v27 = vsel %vm49_vm1, %v130_v25, 0.0  ;;  %v131_v28 = vmul.f32 %v313_v26, %v127_v23 }
  0xed   :  { %133 = vadd.xlane.f32.xlu0 %v132_v27 }
  0xee   :  { %v135_v29 = vsel %vm49_vm1, %v131_v28, 0.0 }
  0xf1   :  { %136 = vadd.xlane.f32.xlu0 %v135_v29 }
 0x17a   :  { %v134_v31 = vpop.xlane.xlu0 %133 }
 0x17b   :  { %v145_v34 = vrot.slane %v134_v31, %v144_v32 }
 0x17e   :  { %v137_v33 = vpop.xlane.xlu0 %136 }
 0x17f   :  { %v149_v35 = vrot.slane %v137_v33, %v144_v32 }
 0x181   :  { %v151_v36 = vsel %vm150_vm2, %v149_v35, %v145_v34 }
 0x182   :  { %v154_v37 = vsel %vm153_vm3, %v151_v36, -inf }
 0x183   :  { %155 = vmax.xlane.f32.xlu1 %v154_v37 }
 0x210   :  { %v156_v40 = vpop.xlane.xlu1 %155 }
 0x211   :  { %v161_v41 = vrot.slane %v156_v40, %v122_v20  ;;  %v165_v42 = vrot.slane %v156_v40, %v164_v39 }
 0x213   :  { %v168_v43 = vsub.f32 %v134_v31, %v161_v41  ;;  %v169_v44 = vsub.f32 %v137_v33, %v165_v42 }
 0x215   :  { %v170_v45 = vmul.f32 1.442695, %v168_v43  ;;  %v172_v46 = vmul.f32 1.442695, %v169_v44 }
 0x217   :  { %314 = vpow2.f32 %v170_v45 }
 0x218   :  { %316 = vpow2.f32 %v172_v46 }
 0x221   :  { %v315_v47 = vpop.eup %314 }
 0x222   :  { %v317_v48 = vpop.eup %316  ;;  %177 = vperm.xlu1 %304, %v315_v47  }
 0x223   :  { %180 = vperm.xlu0 %305, %v317_v48  }
 0x2a1   :  { %v178_v49 = vpop.permute.xlu1 %177 }
 0x2a2   :  { %v181_v50 = vpop.permute.xlu0 %180  ;;  %v185_v51 = vrot.slane %v178_v49, %v144_v32 }
 0x2a3   :  { %v189_v52 = vrot.slane %v181_v50, %v144_v32 }
 0x2a5   :  { %v190_v53 = vsel %vm150_vm2, %v189_v52, %v185_v51 }
 0x2a6   :  { %v192_v54 = vsel %vm153_vm3, %v190_v53, 0.0 }
 0x2a7   :  { %193 = vadd.xlane.f32.xlu1 %v192_v54 }
 0x334   :  { %v194_v55 = vpop.xlane.xlu1 %193 }
 0x335   :  { %318 = vrcp.f32 %v194_v55 }
 0x33f   :  { %v319_v56 = vpop.eup %318 }
 0x340   :  { %v200_v57 = vrot.slane %v319_v56, %v122_v20  ;;  %v204_v59 = vrot.slane %v319_v56, %v164_v39 }
 0x342   :  { %v207_v58 = vmul.f32 %v315_v47, %v200_v57  ;;  %v208_v60 = vmul.f32 %v317_v48, %v204_v59 }
 0x344   :  { %213 = vperm.xlu0 %305, %v207_v58  }
 0x348   :  { %218 = vperm.xlu0 %305, %v208_v60  }
 0x3c3   :  { %v214_v62 = vpop.permute.xlu0 %213 }
 0x3c4   :  { %v221_v63 = vmul.f32 %v214_v62, %v209_v61 }
 0x3c6   :  { %v223_v1 = vsel %vm49_vm1, %v221_v63, 0.0 }
 0x3c7   :  { %v224_v2 = vrot.slane %v223_v1, 4  ;;  %v219_v4 = vpop.permute.xlu0 %218 }
 0x3c8   :  { %v222_v5 = vmul.f32 %v219_v4, %v210_v0 }
 0x3c9   :  { %v225_v6 = vadd.f32 %v224_v2, %v223_v1 }
 0x3ca   :  { %v230_v7 = vsel %vm49_vm1, %v222_v5, 0.0 }
 0x3cb   :  { %v226_v8 = vrot.slane %v225_v6, 2  ;;  %v231_v9 = vrot.slane %v230_v7, 4 }
 0x3cd   :  { %v227_v10 = vadd.f32 %v226_v8, %v225_v6  ;;  %v232_v11 = vadd.f32 %v231_v9, %v230_v7 }
 0x3cf   :  { %v228_v12 = vrot.slane %v227_v10, 1  ;;  %v233_v13 = vrot.slane %v232_v11, 2 }
 0x3d1   :  { %v234_v14 = vadd.f32 %v233_v13, %v232_v11  ;;  %v229_v15 = vadd.f32 %v228_v12, %v227_v10 }
 0x3d3   :  { %v235_v16 = vrot.slane %v234_v14, 1  ;;  %v237_v18 = vmul.f32 %v229_v15, %v229_v15 }
 0x3d5   :  { %v236_v17 = vadd.f32 %v235_v16, %v234_v14 }
 0x3d7   :  { %v238_v3 = vmul.f32 %v236_v17, %v236_v17 }
 0x3d9   :  { %v241_v19 = vsel %vm150_vm2, %v238_v3, %v237_v18 }
 0x3da   :  { %v244_v20 = vsel %vm243_vm4, %v241_v19, 0.0 }
 0x3db   :  { %245 = vadd.xlane.f32.xlu1 %v244_v20 }
 0x468   :  { %v246_v21 = vpop.xlane.xlu1 %245 }
 0x469   :  { %320 = vrsqrt.f32 %v246_v21  ;;  %vm249_vm5 = vcmp.eq.f32.partialorder %v246_v21, inf  ;;  %v252_v24 = vand.u32 2147483648, %v246_v21  ;;  %vm251_vm6 = vcmp.eq.f32.partialorder %v246_v21, 0.0 }
 0x473   :  { %v321_v22 = vpop.eup %320 }
 0x474   :  { %v248_v23 = vmul.f32 %v321_v22, %v246_v21 }
 0x476   :  { %v250_v25 = vsel %vm249_vm5, %v246_v21, %v248_v23 }
 0x477   :  { %v253_v26 = vsel %vm251_vm6, %v252_v24, %v250_v25 }
 0x478   :  { %v254_v27 = vadd.f32 1e-08, %v253_v26 }
 0x47a   :  { %322 = vrcp.f32 %v254_v27 }
 0x484   :  { %v323_v28 = vpop.eup %322 }
 0x485   :  { %v257_v29 = vrot.slane %v323_v28, 1  ;;  %v260_v31 = vmul.f32 %v323_v28, %v229_v15 }
 0x487   :  { %v261_v30 = vmul.f32 %v257_v29, %v236_v17 }
 0x489   :  { %v264_v32 = vrot.slane %v261_v30, 7 }
 0x48b   :  { %v265_v33 = vsel %vm150_vm2, %v264_v32, %v260_v31 }
 0x48c   :  { %267 = vst.msk [vmem:[#allocation2] sm:$0x3] %vm243_vm4, %v265_v33 }
 0x48d   :  { %335 = shalt.err (!%p332_p4)
}
 0x48e   :  { %s336_s26 = scalar_lea.hbm %s433_s4, 32 }
 0x48f   :  { %p337_p5 = scmp.ne.s32.totalorder %s433_s4, %s336_s26  ;;  %p340_p6 = scmp.lt.u32.totalorder %s336_s26, %s433_s4 }
 0x491   :  { %p342_p7 = pnand %p340_p6, %p337_p5 }
 0x493   :  { %345 = shalt.err (!%p342_p7)
}
 0x494   :  { %277 = dma.vmem_to_hbm [thread:$0]  %s275_s3, 32, %s433_s4, [#allocation3]  }
 0x495   :  { %346 = dma.done.wait [#allocation3], 32  }
 0x496   :  { %347 = vsyncadd [#allocation3], 4294967264 }
 0x497   :  { %281 = vsyncpa [#allocation3], 1 }

</bundles_post_ra>
